<compile_context>
chip_gen: v7x
topology: tpu7x:2x2x1
jax: 0.10.0
libtpu: 0.0.40
codegen_flags: <defaults>
</compile_context>

<pallas_src>
import functools

import jax
import jax.numpy as jnp
from jax import lax
from jax.experimental import pallas as pl
from jax.experimental.pallas import tpu as pltpu


def _normface_loss_kernel(cos_ref, tgt_ref, *refs,
                          scaling, num_classes, tc, n_class_tiles, compute_output):
    if compute_output:
        out_ref = refs[0]
        refs = refs[1:]
    else:
        out_ref = None
    loss_ref, m_ref, l_ref, t_ref = refs

    j = pl.program_id(1)

    @pl.when(j == 0)
    def _init():
        m_ref[...] = jnp.full(m_ref.shape, -jnp.inf, dtype=jnp.float32)
        l_ref[...] = jnp.zeros(l_ref.shape, dtype=jnp.float32)
        t_ref[...] = jnp.zeros(t_ref.shape, dtype=jnp.float32)

    # Scaled logits for this tile, accumulated in f32 regardless of input dtype.
    x = cos_ref[...].astype(jnp.float32) * scaling                 # (tB, tC)

    if compute_output:
        out_ref[...] = x.astype(out_ref.dtype)                     # 'output' = scaling * cosine

    tb_dim, tc_dim = x.shape
    local_col = lax.broadcasted_iota(jnp.int32, (tb_dim, tc_dim), 1)
    local_tgt = tgt_ref[...] - j * tc_dim                          # (tB, 1) scalar subtract/row

    def lse_and_gather(x_lse):
        # Online (flash-style) log-sum-exp update.
        m_prev = m_ref[...]
        m_new = jnp.maximum(m_prev, jnp.max(x_lse, axis=-1, keepdims=True))
        alpha = jnp.exp(m_prev - m_new)                            # 0 at j==0 (m_prev = -inf)
        l_ref[...] = alpha * l_ref[...] + jnp.sum(jnp.exp(x_lse - m_new),
                                                  axis=-1, keepdims=True)
        m_ref[...] = m_new
        # Target-logit gather: labels are always < C, so padded lanes never match.
        onehot = local_col == local_tgt
        t_ref[...] += jnp.sum(jnp.where(onehot, x, 0.0), axis=-1, keepdims=True)

    def finalize():
        loss_ref[...] = (m_ref[...] + jnp.log(l_ref[...])) - t_ref[...]

    tail_valid = num_classes - (n_class_tiles - 1) * tc            # valid lanes in last tile
    needs_mask = tail_valid != tc                                  # trace-time decision

    if n_class_tiles == 1:
        # Single class tile covers the full axis (tc == C), no masking needed.
        if needs_mask:
            lse_and_gather(jnp.where(local_col >= tail_valid, -jnp.inf, x))
        else:
            lse_and_gather(x)
        finalize()
    elif needs_mask:
        @pl.when(j < n_class_tiles - 1)
        def _full_tiles():
            lse_and_gather(x)                                      # no mask work on hot path

        @pl.when(j == n_class_tiles - 1)
        def _tail_tile():
            lse_and_gather(jnp.where(local_col >= tail_valid, -jnp.inf, x))
            finalize()
    else:
        lse_and_gather(x)

        @pl.when(j == n_class_tiles - 1)
        def _fin():
            finalize()


def _pick_class_tile(C, cap, align=128):
    cap = max(align, (cap // align) * align)
    if C <= cap:
        return C                   # one tile covering the whole axis (block == dim is legal)
    return cap                     # aligned tile; ragged tail masked in-kernel


def _pick_batch_tile(B, cap, align):
    """Dtype-aligned batch tile; ensure >= 2 batch tiles when possible (v7x megacore)."""
    cap = max(align, (cap // align) * align)
    if B <= align:
        return B
    half = max(align, ((B // 2) // align) * align)
    return min(cap, half)


def normface_loss(net_out, targets, scaling=16, *, block_b=256, block_c=4096,
                  compute_output=True):
    """JAX/Pallas equivalent of NormFaceLoss.forward.

    net_out: dict with 'cosine_fea2cen' -> [B, C] cosine similarities (f32/bf16)
    targets: int labels [B]
    compute_output: if False, skip the full [B, C] scaled-logits writeback (loss only).
    returns: {'loss': scalar f32, 'output': scaling * cosine (or None if skipped)}
    """
    cosine = net_out['cosine_fea2cen']
    B, C = cosine.shape
    tgt2d = targets.astype(jnp.int32).reshape(B, 1)

    itemsize = jnp.dtype(cosine.dtype).itemsize
    align_b = {4: 8, 2: 16, 1: 32}.get(itemsize, 8)        # sub-32-bit packs along sublanes

    tb = _pick_batch_tile(B, block_b, align_b)
    tc = _pick_class_tile(C, block_c, 128)
    n_i = pl.cdiv(B, tb)
    n_j = pl.cdiv(C, tc)

    kernel = functools.partial(
        _normface_loss_kernel, scaling=float(scaling), num_classes=C,
        tc=tc, n_class_tiles=n_j, compute_output=compute_output)

    if compute_output:
        out_shape = (
            jax.ShapeDtypeStruct((B, C), cosine.dtype),     # scaled logits ('output')
            jax.ShapeDtypeStruct((B, 1), jnp.float32),      # per-row CE loss
        )
        out_specs = [
            pl.BlockSpec((tb, tc), lambda i, j: (i, j)),
            pl.BlockSpec((tb, 1), lambda i, j: (i, 0)),
        ]
    else:
        out_shape = (jax.ShapeDtypeStruct((B, 1), jnp.float32),)
        out_specs = [pl.BlockSpec((tb, 1), lambda i, j: (i, 0))]

    outs = pl.pallas_call(
        kernel,
        out_shape=out_shape,
        grid_spec=pltpu.PrefetchScalarGridSpec(
            num_scalar_prefetch=0,
            grid=(n_i, n_j),
            in_specs=[
                pl.BlockSpec((tb, tc), lambda i, j: (i, j)),
                pl.BlockSpec((tb, 1), lambda i, j: (i, 0)),   # targets, class-axis resident
            ],
            out_specs=out_specs,
            scratch_shapes=[
                pltpu.VMEM((tb, 1), jnp.float32),   # running max
                pltpu.VMEM((tb, 1), jnp.float32),   # running sum-exp
                pltpu.VMEM((tb, 1), jnp.float32),   # target logit
            ],
        ),
        compiler_params=pltpu.CompilerParams(
            dimension_semantics=("parallel", "arbitrary"),
            vmem_limit_bytes=48 * 1024 * 1024,
        ),
    )(cosine, tgt2d)

    if compute_output:
        output, loss_rows = outs
    else:
        output = None
        loss_rows = outs[0] if isinstance(outs, (list, tuple)) else outs

    loss = jnp.mean(loss_rows)
    return {'loss': loss, 'output': output}


if __name__ == "__main__":
    key = jax.random.PRNGKey(0)
    k_cos, k_tgt = jax.random.split(key)

    # Small shapes; C=200 with block_c=128 exercises multi-tile + ragged class tail,
    # B=16 with block_b=8 exercises the 2-wide (megacore-friendly) batch grid.
    B, C = 16, 200
    cosine = jax.random.uniform(k_cos, (B, C), dtype=jnp.float32, minval=-1.0, maxval=1.0)
    targets = jax.random.randint(k_tgt, (B,), 0, C, dtype=jnp.int32)

    net_out = {'cosine_fea2cen': cosine}
    res = normface_loss(net_out, targets, scaling=16, block_b=8, block_c=128)
    loss = jax.block_until_ready(res['loss'])
    output = jax.block_until_ready(res['output'])

    # Loss-only path (skips the [B, C] writeback entirely).
    res_lo = normface_loss(net_out, targets, scaling=16, block_b=8, block_c=128,
                           compute_output=False)
    loss_lo = jax.block_until_ready(res_lo['loss'])

    # Reference: same math as torch.nn.CrossEntropyLoss (mean reduction) on 16 * cosine.
    ref_logits = 16.0 * cosine
    ref_loss = jnp.mean(
        jax.nn.logsumexp(ref_logits, axis=-1) - ref_logits[jnp.arange(B), targets])

    assert output.shape == (B, C) and output.dtype == cosine.dtype
    assert jnp.allclose(output, ref_logits, atol=1e-6, rtol=1e-6), "output mismatch"
    assert jnp.allclose(loss, ref_loss, atol=1e-4, rtol=1e-4), (loss, ref_loss)
    assert jnp.allclose(loss_lo, ref_loss, atol=1e-4, rtol=1e-4), (loss_lo, ref_loss)
    assert res_lo['output'] is None

    print("KERNEL_OK")
</pallas_src>

<mosaic_0001>
module attributes {stable_mosaic.version = 11 : i64} {
  func.func @_normface_loss_kernel(%arg0: i32, %arg1: i32, %arg2: memref<8x128xf32, #tpu.memory_space<vmem>>, %arg3: memref<8x1xi32, #tpu.memory_space<vmem>>, %arg4: memref<8x128xf32, #tpu.memory_space<vmem>>, %arg5: memref<8x1xf32, #tpu.memory_space<vmem>>, %arg6: memref<8x1xf32, #tpu.memory_space<vmem>>, %arg7: memref<8x1xf32, #tpu.memory_space<vmem>>, %arg8: memref<8x1xf32, #tpu.memory_space<vmem>>) attributes {dimension_semantics = [#tpu.dimension_semantics<parallel>, #tpu.dimension_semantics<arbitrary>], iteration_bounds = array<i64: 2, 2>, scalar_prefetch = 0 : i64, scratch_operands = 3 : i64, tpu.core_type = #tpu.core_type<tc>, window_params = [{transform_indices = @transform_0, window_bounds = array<i64: 8, 128>}, {transform_indices = @transform_1, window_bounds = array<i64: 8, 1>}, {transform_indices = @transform_2, window_bounds = array<i64: 8, 128>}, {transform_indices = @transform_3, window_bounds = array<i64: 8, 1>}]} {
    %c0_i32 = arith.constant 0 : i32
    %0 = arith.cmpi eq, %arg1, %c0_i32 : i32
    %1 = arith.extui %0 : i1 to i32
    %c0_i32_0 = arith.constant 0 : i32
    %2 = arith.cmpi ne, %1, %c0_i32_0 : i32
    scf.if %2 {
      %cst_9 = arith.constant 0xFF800000 : f32
      %18 = vector.broadcast %cst_9 : f32 to vector<8x1xf32>
      %c0_10 = arith.constant 0 : index
      %c0_11 = arith.constant 0 : index
      %19 = vector.load %arg6[%c0_10, %c0_11] : memref<8x1xf32, #tpu.memory_space<vmem>>, vector<8x1xf32>
      tpu.vector_store %arg6[%c0_10, %c0_11], %18 {strides = array<i32>} : memref<8x1xf32, #tpu.memory_space<vmem>>, vector<8x1xf32>,
      %cst_12 = arith.constant 0.000000e+00 : f32
      %20 = vector.broadcast %cst_12 : f32 to vector<8x1xf32>
      %c0_13 = arith.constant 0 : index
      %c0_14 = arith.constant 0 : index
      %21 = vector.load %arg7[%c0_13, %c0_14] : memref<8x1xf32, #tpu.memory_space<vmem>>, vector<8x1xf32>
      tpu.vector_store %arg7[%c0_13, %c0_14], %20 {strides = array<i32>} : memref<8x1xf32, #tpu.memory_space<vmem>>, vector<8x1xf32>,
      %cst_15 = arith.constant 0.000000e+00 : f32
      %22 = vector.broadcast %cst_15 : f32 to vector<8x1xf32>
      %c0_16 = arith.constant 0 : index
      %c0_17 = arith.constant 0 : index
      %23 = vector.load %arg8[%c0_16, %c0_17] : memref<8x1xf32, #tpu.memory_space<vmem>>, vector<8x1xf32>
      tpu.vector_store %arg8[%c0_16, %c0_17], %22 {strides = array<i32>} : memref<8x1xf32, #tpu.memory_space<vmem>>, vector<8x1xf32>,
    } else {
    }
    %c0 = arith.constant 0 : index
    %c0_1 = arith.constant 0 : index
    %3 = vector.load %arg2[%c0, %c0_1] : memref<8x128xf32, #tpu.memory_space<vmem>>, vector<8x128xf32>
    %cst = arith.constant 1.600000e+01 : f32
    %4 = vector.broadcast %cst : f32 to vector<8x128xf32>
    %5 = arith.mulf %3, %4 : vector<8x128xf32>
    %c0_2 = arith.constant 0 : index
    %c0_3 = arith.constant 0 : index
    %6 = vector.load %arg4[%c0_2, %c0_3] : memref<8x128xf32, #tpu.memory_space<vmem>>, vector<8x128xf32>
    tpu.vector_store %arg4[%c0_2, %c0_3], %5 {strides = array<i32>} : memref<8x128xf32, #tpu.memory_space<vmem>>, vector<8x128xf32>,
    %7 = tpu.iota {dimensions = array<i32: 1>} : vector<8x128xi32>
    %c0_4 = arith.constant 0 : index
    %c0_5 = arith.constant 0 : index
    %8 = vector.load %arg3[%c0_4, %c0_5] : memref<8x1xi32, #tpu.memory_space<vmem>>, vector<8x1xi32>
    %c128_i32 = arith.constant 128 : i32
    %9 = arith.muli %arg1, %c128_i32 : i32
    %10 = vector.broadcast %9 : i32 to vector<8x1xi32>
    %11 = arith.subi %8, %10 : vector<8x1xi32>
    %c1_i32 = arith.constant 1 : i32
    %12 = arith.cmpi slt, %arg1, %c1_i32 : i32
    %13 = arith.extui %12 : i1 to i32
    %c0_i32_6 = arith.constant 0 : i32
    %14 = arith.cmpi ne, %13, %c0_i32_6 : i32
    scf.if %14 {
      %c0_9 = arith.constant 0 : index
      %c0_10 = arith.constant 0 : index
      %18 = vector.load %arg6[%c0_9, %c0_10] : memref<8x1xf32, #tpu.memory_space<vmem>>, vector<8x1xf32>
      %cst_11 = arith.constant dense<0xFF800000> : vector<8xf32>
      %19 = vector.multi_reduction <maximumf>, %5, %cst_11 [1] : vector<8x128xf32> to vector<8xf32>
      %20 = vector.shape_cast %19 : vector<8xf32> to vector<8x1xf32>
      %21 = arith.maximumf %18, %20 : vector<8x1xf32>
      %22 = arith.subf %18, %21 : vector<8x1xf32>
      %23 = math.exp %22 : vector<8x1xf32>
      %c0_12 = arith.constant 0 : index
      %c0_13 = arith.constant 0 : index
      %24 = vector.load %arg7[%c0_12, %c0_13] : memref<8x1xf32, #tpu.memory_space<vmem>>, vector<8x1xf32>
      %25 = arith.mulf %23, %24 : vector<8x1xf32>
      %26 = vector.broadcast %21 : vector<8x1xf32> to vector<8x128xf32>
      %27 = arith.subf %5, %26 : vector<8x128xf32>
      %28 = math.exp %27 : vector<8x128xf32>
      %cst_14 = arith.constant dense<0.000000e+00> : vector<8xf32>
      %29 = vector.multi_reduction <add>, %28, %cst_14 [1] : vector<8x128xf32> to vector<8xf32>
      %30 = vector.shape_cast %29 : vector<8xf32> to vector<8x1xf32>
      %31 = arith.addf %25, %30 : vector<8x1xf32>
      %c0_15 = arith.constant 0 : index
      %c0_16 = arith.constant 0 : index
      %32 = vector.load %arg7[%c0_15, %c0_16] : memref<8x1xf32, #tpu.memory_space<vmem>>, vector<8x1xf32>
      tpu.vector_store %arg7[%c0_15, %c0_16], %31 {strides = array<i32>} : memref<8x1xf32, #tpu.memory_space<vmem>>, vector<8x1xf32>,
      %c0_17 = arith.constant 0 : index
      %c0_18 = arith.constant 0 : index
      %33 = vector.load %arg6[%c0_17, %c0_18] : memref<8x1xf32, #tpu.memory_space<vmem>>, vector<8x1xf32>
      tpu.vector_store %arg6[%c0_17, %c0_18], %21 {strides = array<i32>} : memref<8x1xf32, #tpu.memory_space<vmem>>, vector<8x1xf32>,
      %34 = vector.broadcast %11 : vector<8x1xi32> to vector<8x128xi32>
      %35 = arith.cmpi eq, %7, %34 : vector<8x128xi32>
      %c0_19 = arith.constant 0 : index
      %c0_20 = arith.constant 0 : index
      %36 = vector.load %arg8[%c0_19, %c0_20] : memref<8x1xf32, #tpu.memory_space<vmem>>, vector<8x1xf32>
      %cst_21 = arith.constant 0.000000e+00 : f32
      %37 = vector.broadcast %cst_21 : f32 to vector<8x128xf32>
      %38 = arith.select %35, %5, %37 : vector<8x128xi1>, vector<8x128xf32>
      %cst_22 = arith.constant dense<0.000000e+00> : vector<8xf32>
      %39 = vector.multi_reduction <add>, %38, %cst_22 [1] : vector<8x128xf32> to vector<8xf32>
      %40 = vector.shape_cast %39 : vector<8xf32> to vector<8x1xf32>
      %41 = arith.addf %36, %40 : vector<8x1xf32>
      %c0_23 = arith.constant 0 : index
      %c0_24 = arith.constant 0 : index
      %42 = vector.load %arg8[%c0_23, %c0_24] : memref<8x1xf32, #tpu.memory_space<vmem>>, vector<8x1xf32>
      tpu.vector_store %arg8[%c0_23, %c0_24], %41 {strides = array<i32>} : memref<8x1xf32, #tpu.memory_space<vmem>>, vector<8x1xf32>,
    } else {
    }
    %c1_i32_7 = arith.constant 1 : i32
    %15 = arith.cmpi eq, %arg1, %c1_i32_7 : i32
    %16 = arith.extui %15 : i1 to i32
    %c0_i32_8 = arith.constant 0 : i32
    %17 = arith.cmpi ne, %16, %c0_i32_8 : i32
    scf.if %17 {
      %c72_i32 = arith.constant 72 : i32
      %18 = vector.broadcast %c72_i32 : i32 to vector<8x128xi32>
      %19 = arith.cmpi sge, %7, %18 : vector<8x128xi32>
      %cst_9 = arith.constant 0xFF800000 : f32
      %20 = vector.broadcast %cst_9 : f32 to vector<8x128xf32>
      %21 = arith.select %19, %20, %5 : vector<8x128xi1>, vector<8x128xf32>
      %c0_10 = arith.constant 0 : index
      %c0_11 = arith.constant 0 : index
      %22 = vector.load %arg6[%c0_10, %c0_11] : memref<8x1xf32, #tpu.memory_space<vmem>>, vector<8x1xf32>
      %cst_12 = arith.constant dense<0xFF800000> : vector<8xf32>
      %23 = vector.multi_reduction <maximumf>, %21, %cst_12 [1] : vector<8x128xf32> to vector<8xf32>
      %24 = vector.shape_cast %23 : vector<8xf32> to vector<8x1xf32>
      %25 = arith.maximumf %22, %24 : vector<8x1xf32>
      %26 = arith.subf %22, %25 : vector<8x1xf32>
      %27 = math.exp %26 : vector<8x1xf32>
      %c0_13 = arith.constant 0 : index
      %c0_14 = arith.constant 0 : index
      %28 = vector.load %arg7[%c0_13, %c0_14] : memref<8x1xf32, #tpu.memory_space<vmem>>, vector<8x1xf32>
      %29 = arith.mulf %27, %28 : vector<8x1xf32>
      %30 = vector.broadcast %25 : vector<8x1xf32> to vector<8x128xf32>
      %31 = arith.subf %21, %30 : vector<8x128xf32>
      %32 = math.exp %31 : vector<8x128xf32>
      %cst_15 = arith.constant dense<0.000000e+00> : vector<8xf32>
      %33 = vector.multi_reduction <add>, %32, %cst_15 [1] : vector<8x128xf32> to vector<8xf32>
      %34 = vector.shape_cast %33 : vector<8xf32> to vector<8x1xf32>
      %35 = arith.addf %29, %34 : vector<8x1xf32>
      %c0_16 = arith.constant 0 : index
      %c0_17 = arith.constant 0 : index
      %36 = vector.load %arg7[%c0_16, %c0_17] : memref<8x1xf32, #tpu.memory_space<vmem>>, vector<8x1xf32>
      tpu.vector_store %arg7[%c0_16, %c0_17], %35 {strides = array<i32>} : memref<8x1xf32, #tpu.memory_space<vmem>>, vector<8x1xf32>,
      %c0_18 = arith.constant 0 : index
      %c0_19 = arith.constant 0 : index
      %37 = vector.load %arg6[%c0_18, %c0_19] : memref<8x1xf32, #tpu.memory_space<vmem>>, vector<8x1xf32>
      tpu.vector_store %arg6[%c0_18, %c0_19], %25 {strides = array<i32>} : memref<8x1xf32, #tpu.memory_space<vmem>>, vector<8x1xf32>,
      %38 = vector.broadcast %11 : vector<8x1xi32> to vector<8x128xi32>
      %39 = arith.cmpi eq, %7, %38 : vector<8x128xi32>
      %c0_20 = arith.constant 0 : index
      %c0_21 = arith.constant 0 : index
      %40 = vector.load %arg8[%c0_20, %c0_21] : memref<8x1xf32, #tpu.memory_space<vmem>>, vector<8x1xf32>
      %cst_22 = arith.constant 0.000000e+00 : f32
      %41 = vector.broadcast %cst_22 : f32 to vector<8x128xf32>
      %42 = arith.select %39, %5, %41 : vector<8x128xi1>, vector<8x128xf32>
      %cst_23 = arith.constant dense<0.000000e+00> : vector<8xf32>
      %43 = vector.multi_reduction <add>, %42, %cst_23 [1] : vector<8x128xf32> to vector<8xf32>
      %44 = vector.shape_cast %43 : vector<8xf32> to vector<8x1xf32>
      %45 = arith.addf %40, %44 : vector<8x1xf32>
      %c0_24 = arith.constant 0 : index
      %c0_25 = arith.constant 0 : index
      %46 = vector.load %arg8[%c0_24, %c0_25] : memref<8x1xf32, #tpu.memory_space<vmem>>, vector<8x1xf32>
      tpu.vector_store %arg8[%c0_24, %c0_25], %45 {strides = array<i32>} : memref<8x1xf32, #tpu.memory_space<vmem>>, vector<8x1xf32>,
      %c0_26 = arith.constant 0 : index
      %c0_27 = arith.constant 0 : index
      %47 = vector.load %arg6[%c0_26, %c0_27] : memref<8x1xf32, #tpu.memory_space<vmem>>, vector<8x1xf32>
      %c0_28 = arith.constant 0 : index
      %c0_29 = arith.constant 0 : index
      %48 = vector.load %arg7[%c0_28, %c0_29] : memref<8x1xf32, #tpu.memory_space<vmem>>, vector<8x1xf32>
      %49 = math.log %48 : vector<8x1xf32>
      %50 = arith.addf %47, %49 : vector<8x1xf32>
      %c0_30 = arith.constant 0 : index
      %c0_31 = arith.constant 0 : index
      %51 = vector.load %arg8[%c0_30, %c0_31] : memref<8x1xf32, #tpu.memory_space<vmem>>, vector<8x1xf32>
      %52 = arith.subf %50, %51 : vector<8x1xf32>
      %c0_32 = arith.constant 0 : index
      %c0_33 = arith.constant 0 : index
      %53 = vector.load %arg5[%c0_32, %c0_33] : memref<8x1xf32, #tpu.memory_space<vmem>>, vector<8x1xf32>
      tpu.vector_store %arg5[%c0_32, %c0_33], %52 {strides = array<i32>} : memref<8x1xf32, #tpu.memory_space<vmem>>, vector<8x1xf32>,
    } else {
    }
    return
  }
  func.func @transform_0(%arg0: i32, %arg1: i32) -> (i32, i32) {
    %c0_i32 = arith.constant 0 : i32
    return %arg0, %arg1 : i32, i32
  }
  func.func @transform_1(%arg0: i32, %arg1: i32) -> (i32, i32) {
    %c0_i32 = arith.constant 0 : i32
    %c0_i32_0 = arith.constant 0 : i32
    return %arg0, %c0_i32 : i32, i32
  }
  func.func @transform_2(%arg0: i32, %arg1: i32) -> (i32, i32) {
    %c0_i32 = arith.constant 0 : i32
    return %arg0, %arg1 : i32, i32
  }
  func.func @transform_3(%arg0: i32, %arg1: i32) -> (i32, i32) {
    %c0_i32 = arith.constant 0 : i32
    %c0_i32_0 = arith.constant 0 : i32
    return %arg0, %c0_i32 : i32, i32
  }
}

</mosaic_0001>

<bundles_post_ra>
// kernel: tpu_custom_call.1
= control target key start
LH: loop header
LB: loop body
LE: loop exit
PB: predicated region body
PF: predicated region fallthrough
CT: control target
= control target key end

     0   :  { %9 = vsyncpa [#allocation6], 0  ;;  %s976_s0 = inlined_call_operand.hbm [shape: f32[16,200], index: 0, kind: input, shape index: {}]   ;;  %s977_s1 = inlined_call_operand.vmem [shape: s32[16,1], index: 1, kind: input, shape index: {}]   ;;  %s978_s2 = inlined_call_operand.hbm [shape: f32[16,200], index: 2, kind: output, shape index: {0}]   ;;  %s979_s3 = inlined_call_operand.vmem [shape: f32[16,1], index: 3, kind: output, shape index: {1}]  }
   0x1   :  { %11 = vsyncpa [#allocation6 + $0x1], 0 }
   0x2   :  { %12 = vsyncpa [#allocation7], 0 }
   0x3   :  { %14 = vsyncpa [#allocation7 + $0x1], 0  ;;  %s750_s12 = smov 0   ;;  %s752_s13 = smov 0  }
   0x4   :  { %s754_s14 = smov 0   ;;  %s756_s15 = smov 0  }
   0x5   :  { %s758_s16 = smov 0   ;;  %s760_s17 = smov 0  }
   0x6   :  { %s762_s18 = smov 0   ;;  %s764_s19 = smov 0  }
   0x7 LB: > { %s477_s20 = sadd.s32 4294967295, %s722_s19   ;;  %s478_s21 = sadd.s32 4294967294, %s722_s19   ;;  %s722_s19 = sphi %s764_s19, %s20_s19   ;;  %s718_s18 = sphi %s762_s18, %s996_s18   ;;  %s714_s17 = sphi %s760_s17, %s995_s17   ;;  %s710_s16 = sphi %s758_s16, %s994_s16   ;;  %s706_s15 = sphi %s756_s15, %s993_s15   ;;  %s702_s14 = sphi %s754_s14, %s992_s14   ;;  %s698_s13 = sphi %s752_s13, %s991_s13   ;;  %s694_s12 = sphi %s750_s12, %s990_s12  }
   0x8   : > { %s29_s22 = sadd.s32 1, %s714_s17  ;;  %s32_s23 = sadd.s32 1, %s718_s18 }
   0x9   : > { %p30_p0 = scmp.ge.s32.totalorder %s29_s22, 2  ;;  %s41_s24 = sadd.s32 1, %s702_s14 }
   0xa   : > { %p48_p1 = scmp.ne.s32.totalorder %s702_s14, %s698_s13  ;;  %p49_p2 = scmp.eq.s32.totalorder %s722_s19, 0 }
   0xb   : > { %s998_s22 = smov (%p30_p0, %s29_s22), 0  ;;  %s1000_s23 = smov (!%p30_p0, %s32_s23), %s718_s18 }
   0xc   : > { %s37_s25 = ssub.s32 %s714_s17, %s998_s22  ;;  %p803_p3 = por %p49_p2, %p48_p1 }
   0xd   : > { %p34_p4 = scmp.ge.s32.totalorder %s1000_s23, 2  ;;  %p54_p5 = scmp.ne.s32.totalorder %s698_s13, %s694_s12 }
   0xe   : > { %p55_p6 = scmp.eq.s32.totalorder %s477_s20, 0  ;;  %p106_p7 = scmp.eq.s32.totalorder %s477_s20, 3 }
   0xf   : > { %s1002_s23 = smov (%p34_p4, %s1000_s23), 0  ;;  %p112_p10 = scmp.eq.s32.totalorder %s478_s21, 3 }
  0x10   : > { %p811_p8 = por %p55_p6, %p54_p5  ;;  %p815_p9 = por %p106_p7, %p48_p1 }
  0x11   : > { %s36_s29 = ssub.s32 %s718_s18, %s1002_s23  ;;  %p821_p12 = por %p112_p10, %p54_p5 }
  0x12   : > { %s983_s28 = scalar_select %p815_p9, 1, 0 }
  0x13   : > { %s38_s30 = sor.u32 %s37_s25, %s36_s29  ;;  %p510_p13 = scmp.lt.s32.totalorder %s722_s19, 4 }
  0x14   : > { %p39_p11 = scmp.eq.s32.totalorder %s38_s30, 0  ;;  %s158_s5 = sand.u32 1, %s702_s14  }
  0x15   : > { %s984_s4 = scalar_select %p821_p12, 1, 0 }
  0x16   : > { %s828_s6 = scalar_select %p39_p11, %s702_s14, %s41_s24  }
  0x17   : > { %s481_s7 = sshll.u32 %s158_s5, 3  ;;  %s482_s8 = sshll.u32 %s718_s18, 1 }
  0x18   : > { %s167_s9 = sadd.s32 %s714_s17, %s482_s8  ;;  %s162_s10 = scalar_lea.vmem [#allocation5], %s481_s7 }
  0x19   : > { %s171_s11 = sshll.u32 %s162_s10, 4  ;;  %s483_s20 = sshll.u32 %s167_s9, 7  ;;  %s832_s11 = int_to_ptr.vmem [resolvable:$true] %s171_s11 }
  0x1a   : > { %s837_s29 = scalar_lea.hbm %s976_s0, %s483_s20  ;;  %p841_p0 = pnand %p510_p13, %p803_p3 }
  0x1b   : > { %s159_s30 = scalar_lea.sflag [#allocation6], %s158_s5  ;;  %s594_s7 = scalar_lea.hbm %s837_s29, 128 }
  0x1c   : > { %p595_p4 = scmp.ne.s32.totalorder %s837_s29, %s594_s7  ;;  %p596_p5 = pneg %p841_p0 }
  0x1d   : > { %s599_s9 = scalar_lea.hbm %s976_s0, 512  ;;  %p600_p3 = scmp.lt.u32.totalorder %s837_s29, %s976_s0 }
  0x1e   : > { %p597_p6 = pnand %p596_p5, %p595_p4  ;;  %p601_p10 = scmp.lt.u32.totalorder %s599_s9, %s594_s7 }
  0x1f   : > { %p603_p13 = scmp.lt.u32.totalorder %s594_s7, %s837_s29 }
  0x20   : > { %p598_p7 = pneg %p597_p6  ;;  %p602_p11 = por %p601_p10, %p600_p3 }
  0x22   : > { %p604_p1 = por %p603_p13, %p602_p11 }
  0x24   : > { %p605_p2 = pnand %p604_p1, %p598_p7 }
  0x26   : > { %608 = shalt.err (!%p605_p2)
}
  0x27   : > { %s609_s5 = scalar_lea.vmem %s832_s11, 128  ;;  %s724_s21 = smov [#allocation5]  }
  0x28   : > { %p610_p4 = scmp.ne.s32.totalorder %s832_s11, %s609_s5  ;;  %s614_s25 = sshll.u32 %s724_s21, 4  ;;  %s615_s25 = int_to_ptr.vmem [resolvable:$false] %s614_s25 }
  0x29   : > { %s616_s26 = scalar_lea.vmem %s615_s25, 256  ;;  %p617_p9 = scmp.lt.s32.totalorder %s832_s11, %s615_s25 }
  0x2a   : > { %p612_p6 = pnand %p610_p4, %p596_p5  ;;  %p618_p3 = scmp.lt.s32.totalorder %s616_s26, %s609_s5 }
  0x2c   : > { %p613_p12 = pneg %p612_p6  ;;  %p619_p10 = por %p618_p3, %p617_p9 }
  0x2e   : > { %p620_p11 = pnand %p619_p10, %p613_p12 }
  0x30   : > { %623 = shalt.err (!%p620_p11)
}
  0x31   : > { %505 = dma.hbm_to_vmem [thread:$0]  (!%p841_p0), %s837_s29, 128, %s832_s11, %s159_s30  }
  0x32   : > { %p986_p1 = scmp.lt.s32.totalorder %s722_s19, 5  ;;  %p987_p2 = scmp.ge.s32.totalorder %s722_s19, 1 }
  0x34   : > { %p184_p5 = pnand %p987_p2, %p986_p1 }
  0x35   : > { %s877_s7 = sand.u32 (!%p184_p5), 1, %s698_s13  }
  0x36   : > { %187 = sbr.rel (%p184_p5) target bundleno = 997 (0x3e5), region = 28  ;;  %s485_s8 = sshll.u32 (!%p184_p5), %s877_s7, 3 }
  0x37   : > { %s190_s9 = scalar_lea.sflag (!%p184_p5), [#allocation6], %s877_s7  ;;  %s193_s10 = scalar_lea.vmem (!%p184_p5), [#allocation5], %s485_s8 }
  0x3d   : > { %685 = dma.done.wait (%p811_p8), %s190_s9, 128  }
  0x3e   : > { %687 = vsyncadd (%p811_p8), %s190_s9, 4294967168  ;;  %p224_p9 = scmp.lt.s32.totalorder %s710_s16, 1  ;;  %s895_s26 = scalar_lea.vmem [#allocation8], %s485_s8 }
  0x3f   : > { %p489_p12 = scmp.ne.s32.totalorder %s706_s15, 0 }
  0x40   : > { %s225_s11 = scalar_select %p224_p9, %s710_s16, 1 }
  0x41   : > { %235 = sbr.rel (%p489_p12) target bundleno = 72 (0x48), region = 36  ;;  %vm236_vm0 = vcmask (!%p489_p12), 7168   ;;  %v725_v0 = vmov (!%p489_p12), -inf   ;;  %v726_v1 = vmov (!%p489_p12), 0.0  }
  0x42   : > { %s487_s29 = sshll.u32 %s225_s11, 3  ;;  %237 = vst.msk [vmem:[#allocation2] sm:$0xff] (!%p489_p12), %vm236_vm0, %v725_v0  ;;  %238 = vst.msk [vmem:[#allocation3] sm:$0xff] (!%p489_p12), %vm236_vm0, %v726_v1 }
  0x43   : > { %s227_s20 = scalar_lea.vmem %s977_s1, %s487_s29  ;;  %s893_s25 = scalar_lea.vmem %s979_s3, %s487_s29  ;;  %239 = vst.msk [vmem:[#allocation4] sm:$0xff] (!%p489_p12), %vm236_vm0, %v726_v1 }
  0x48 PF: > { %v240_v2 = vld [vmem:[%s193_s10] sm:$0xff]  ;;  %v243_v3 = vlaneseq  ;;  %s490_s27 = sshll.u32 %s706_s15, 7  ;;  %p491_p8 = scmp.ge.s32.totalorder %s706_s15, 1 }
  0x49   : > { %v245_v4 = vld [vmem:[%s227_s20] sm:$0xff]  ;;  %v899_v5 = vmul.f32 16.0, %v240_v2  ;;  %v247_v6 = vstv %s490_s27  ;;  %v727_v9 = vmov (!%p491_p8), 0   ;;  %vm273_vm1 = vcmask (!%p491_p8), 7168   ;;  %v260_v22 = vld [vmem:[#allocation3] sm:$0xff] (!%p491_p8) }
  0x4a   : > { %v901_v7 = vand.u32 127, %v243_v3  ;;  %v248_v8 = vsub.s32 %v245_v4, %v247_v6  ;;  %252 = sbr.rel (%p491_p8) target bundleno = 511 (0x1ff), region = 40  ;;  %580 = vset.pattern.permute.xlu0 (!%p491_p8), %v727_v9  ;;  %581 = vset.pattern.permute.xlu1 (!%p491_p8), %v727_v9  ;;  %v253_v10 = vld [vmem:[#allocation2] sm:$0xff] (!%p491_p8)  ;;  %v280_v26 = vld [vmem:[#allocation4] sm:$0xff] (!%p491_p8) }
  0x4b   : > { %242 = vst [vmem:[%s895_s26] sm:$0xff] %v899_v5  ;;  %254 = vmax.xlane.f32.xlu0 (!%p491_p8), %v899_v5 }
  0x4c   : > { %277 = vperm.xlu1 (!%p491_p8), %581, %v248_v8  }
  0xcb   : > { %v278_v17 = vpop.permute.xlu1 %277 }
  0xcc   : > { %vm279_vm2 = vcmp.eq.s32.totalorder %v901_v7, %v278_v17 }
  0xcd   : > { %v281_v19 = vsel %vm279_vm2, %v899_v5, 0.0 }
  0xd8   : > { %v255_v11 = vpop.xlane.xlu0 %254 }
  0xd9   : > { %v256_v12 = vmax.f32 %v253_v10, %v255_v11 }
  0xdb   : > { %v257_v13 = vsub.f32 %v253_v10, %v256_v12  ;;  %275 = vst.msk [vmem:[#allocation2] sm:$0xff] %vm273_vm1, %v256_v12  ;;  %264 = vperm.xlu0 %580, %v256_v12  }
  0xdd   : > { %v258_v20 = vmul.f32 1.442695, %v257_v13 }
 0x15a   : > { %v265_v14 = vpop.permute.xlu0 %264 }
 0x15b   : > { %v267_v15 = vsub.f32 %v899_v5, %v265_v14 }
 0x15d   : > { %v268_v16 = vmul.f32 1.442695, %v267_v15 }
 0x15f   : > { %582 = vpow2.f32 %v268_v16 }
 0x160   : > { %584 = vpow2.f32 %v258_v20 }
 0x169   : > { %v583_v18 = vpop.eup %582 }
 0x16a   : > { %270 = vadd.xlane.f32.xlu1 %v583_v18  ;;  %v585_v21 = vpop.eup %584 }
 0x16b   : > { %v261_v23 = vmul.f32 %v585_v21, %v260_v22 }
 0x16e   : > { %282 = vadd.xlane.f32.xlu1 %v281_v19 }
 0x1f7   : > { %v271_v24 = vpop.xlane.xlu1 %270 }
 0x1f8   : > { %v272_v25 = vadd.f32 %v271_v24, %v261_v23 }
 0x1fa   : > { %274 = vst.msk [vmem:[#allocation3] sm:$0xff] %vm273_vm1, %v272_v25 }
 0x1fb   : > { %v283_v27 = vpop.xlane.xlu1 %282 }
 0x1fc   : > { %v284_v28 = vadd.f32 %v283_v27, %v280_v26 }
 0x1fe   : > { %285 = vst.msk [vmem:[#allocation4] sm:$0xff] %vm273_vm1, %v284_v28 }
 0x1ff PF: > { %p492_p0 = scmp.ne.s32.totalorder %s706_s15, 1 }
 0x200   : > { %vm290_vm3 = vcmp.ge.s32.totalorder (!%p492_p0), %v901_v7, 72  ;;  %v728_v30 = vmov (!%p492_p0), 0   ;;  %v292_v31 = vld [vmem:[#allocation2] sm:$0xff] (!%p492_p0)  ;;  %vm312_vm4 = vcmask (!%p492_p0), 7168  }
 0x201   : > { %289 = sbr.rel (%p492_p0) target bundleno = 971 (0x3cb), region = 44  ;;  %v291_v29 = vsel (!%p492_p0), %vm290_vm3, -inf, %v899_v5  ;;  %586 = vset.pattern.permute.xlu0 (!%p492_p0), %v728_v30  ;;  %587 = vset.pattern.permute.xlu1 (!%p492_p0), %v728_v30  ;;  %v299_v43 = vld [vmem:[#allocation3] sm:$0xff] (!%p492_p0) }
 0x202   : > { %293 = vmax.xlane.f32.xlu0 (!%p492_p0), %v291_v29  ;;  %316 = vperm.xlu1 (!%p492_p0), %587, %v248_v8  }
 0x205   : > { %v319_v47 = vld [vmem:[#allocation4] sm:$0xff] (!%p492_p0) }
 0x281   : > { %v317_v38 = vpop.permute.xlu1 %316 }
 0x282   : > { %vm318_vm5 = vcmp.eq.s32.totalorder %v901_v7, %v317_v38 }
 0x283   : > { %v320_v40 = vsel %vm318_vm5, %v899_v5, 0.0 }
 0x28f   : > { %v294_v32 = vpop.xlane.xlu0 %293 }
 0x290   : > { %v295_v33 = vmax.f32 %v292_v31, %v294_v32 }
 0x292   : > { %v296_v34 = vsub.f32 %v292_v31, %v295_v33  ;;  %314 = vst.msk [vmem:[#allocation2] sm:$0xff] %vm312_vm4, %v295_v33  ;;  %303 = vperm.xlu0 %586, %v295_v33  }
 0x294   : > { %v297_v41 = vmul.f32 1.442695, %v296_v34 }
 0x299   : > { %v325_v53 = vld [vmem:[#allocation2] sm:$0xff] }
 0x311   : > { %v304_v35 = vpop.permute.xlu0 %303 }
 0x312   : > { %v306_v36 = vsub.f32 %v291_v29, %v304_v35 }
 0x314   : > { %v307_v37 = vmul.f32 1.442695, %v306_v36 }
 0x316   : > { %588 = vpow2.f32 %v307_v37 }
 0x317   : > { %590 = vpow2.f32 %v297_v41 }
 0x320   : > { %v589_v39 = vpop.eup %588 }
 0x321   : > { %309 = vadd.xlane.f32.xlu1 %v589_v39  ;;  %v591_v42 = vpop.eup %590 }
 0x322   : > { %v300_v44 = vmul.f32 %v591_v42, %v299_v43 }
 0x325   : > { %321 = vadd.xlane.f32.xlu1 %v320_v40 }
 0x3ae   : > { %v310_v45 = vpop.xlane.xlu1 %309 }
 0x3af   : > { %v311_v46 = vadd.f32 %v310_v45, %v300_v44 }
 0x3b1   : > { %313 = vst.msk [vmem:[#allocation3] sm:$0xff] %vm312_vm4, %v311_v46 }
 0x3b2   : > { %v322_v48 = vpop.xlane.xlu1 %321 }
 0x3b3   : > { %v323_v49 = vadd.f32 %v322_v48, %v319_v47 }
 0x3b5   : > { %324 = vst.msk [vmem:[#allocation4] sm:$0xff] %vm312_vm4, %v323_v49 }
 0x3b8   : > { %v326_v50 = vld [vmem:[#allocation3] sm:$0xff] }
 0x3b9   : > { %592 = vlog2.f32 %v326_v50 }
 0x3bc   : > { %v330_v54 = vld [vmem:[#allocation4] sm:$0xff] }
 0x3c3   : > { %v593_v51 = vpop.eup %592 }
 0x3c4   : > { %v328_v52 = vmul.f32 0.6931472, %v593_v51 }
 0x3c6   : > { %v329_v55 = vadd.f32 %v328_v52, %v325_v53 }
 0x3c8   : > { %v331_v56 = vsub.f32 %v329_v55, %v330_v54 }
 0x3ca   : > { %332 = vst.msk [vmem:[%s893_s25] sm:$0xff] %vm312_vm4, %v331_v56 }
 0x3cb PF: > { %s494_s8 = sshll.u32 %s710_s16, 1  ;;  %s353_s10 = sshll.u32 %s895_s26, 4  ;;  %s926_s10 = int_to_ptr.vmem [resolvable:$true] %s353_s10 }
 0x3cc   : > { %s349_s9 = sadd.s32 %s706_s15, %s494_s8  ;;  %s334_s20 = scalar_lea.sflag [#allocation7], %s877_s7 }
 0x3cd   : > { %s495_s11 = sshll.u32 %s349_s9, 7  ;;  %s624_s5 = scalar_lea.vmem %s926_s10, 128 }
 0x3ce   : > { %s351_s30 = scalar_lea.hbm %s978_s2, %s495_s11  ;;  %p625_p7 = scmp.ne.s32.totalorder %s926_s10, %s624_s5 }
 0x3cf   : > { %p988_p13 = scmp.ne.s32.totalorder %s983_s28, 0  ;;  %s729_s21 = smov [#allocation8]  }
 0x3d0   : > { %s628_s16 = sshll.u32 %s729_s21, 4  ;;  %s629_s16 = int_to_ptr.vmem [resolvable:$false] %s628_s16 }
 0x3d1   : > { %p626_p4 = pnand %p625_p7, %p988_p13  ;;  %s630_s15 = scalar_lea.vmem %s629_s16, 256 }
 0x3d2   : > { %p631_p3 = scmp.lt.s32.totalorder %s926_s10, %s629_s16  ;;  %p632_p10 = scmp.lt.s32.totalorder %s630_s15, %s624_s5 }
 0x3d3   : > { %p627_p6 = pneg %p626_p4 }
 0x3d4   : > { %p633_p11 = por %p632_p10, %p631_p3 }
 0x3d6   : > { %p634_p1 = pnand %p633_p11, %p627_p6 }
 0x3d8   : > { %637 = shalt.err (!%p634_p1)
}
 0x3d9   : > { %s638_s25 = scalar_lea.hbm %s351_s30, 128  ;;  %s642_s27 = scalar_lea.hbm %s978_s2, 512 }
 0x3da   : > { %p639_p2 = scmp.ne.s32.totalorder %s351_s30, %s638_s25  ;;  %p643_p12 = scmp.lt.u32.totalorder %s351_s30, %s978_s2 }
 0x3db   : > { %p644_p8 = scmp.lt.u32.totalorder %s642_s27, %s638_s25  ;;  %p646_p7 = scmp.lt.u32.totalorder %s638_s25, %s351_s30 }
 0x3dc   : > { %p640_p5 = pnand %p639_p2, %p988_p13 }
 0x3dd   : > { %p645_p0 = por %p644_p8, %p643_p12 }
 0x3de   : > { %p641_p9 = pneg %p640_p5 }
 0x3df   : > { %p647_p4 = por %p646_p7, %p645_p0 }
 0x3e1   : > { %p648_p6 = pnand %p647_p4, %p641_p9 }
 0x3e3   : > { %651 = shalt.err (!%p648_p6)
}
 0x3e4   : > { %500 = dma.vmem_to_hbm [thread:$0]  (%p988_p13), %s926_s10, 128, %s351_s30, %s334_s20  }
 0x3e5 PF: > { %p511_p3 = scmp.ge.s32.totalorder %s722_s19, 2  ;;  %s368_s11 = sand.u32 1, %s694_s12  }
 0x3e6   : > { %p989_p10 = scmp.ne.s32.totalorder %s984_s4, 0  ;;  %s369_s29 = scalar_lea.sflag [#allocation7], %s368_s11 }
 0x3e8   : > { %p507_p11 = pnand %p511_p3, %p989_p10 }
 0x3ea   : > { %689 = dma.done.wait (!%p507_p11), %s369_s29, 128  }
 0x3eb   : > { %691 = vsyncadd (!%p507_p11), %s369_s29, 4294967168  ;;  %s20_s19 = sadd.s32 1, %s722_s19   ;;  %s990_s12 = smov %s698_s13 }
 0x3ec   : > { %p17_p1 = scmp.ge.s32.totalorder %s20_s19, 6   ;;  %s991_s13 = smov %s702_s14 }
 0x3ed   : > { %s992_s14 = smov %s828_s6  ;;  %s993_s15 = smov %s714_s17 }
 0x3ee   : > { %s994_s16 = smov %s718_s18  ;;  %s995_s17 = smov %s998_s22 }
 0x3ef   : > { %s996_s18 = smov %s1002_s23  ;;  %19 = sbr.rel (!%p17_p1) target bundleno = 7 (0x7), region = 100 }
 0x3f6   :  { %381 = vsyncpa [#allocation6], 1 }
 0x3f7   :  { %383 = vsyncpa [#allocation6 + $0x1], 1 }
 0x3f8   :  { %384 = vsyncpa [#allocation7], 1 }
 0x3f9   :  { %386 = vsyncpa [#allocation7 + $0x1], 1 }

</bundles_post_ra>
